<compile_context>
chip_gen: v7x
topology: tpu7x:2x2x1
jax: 0.10.0
libtpu: 0.0.40
codegen_flags: <defaults>
</compile_context>

<pallas_src>
import jax
import jax.numpy as jnp
from jax.experimental import pallas as pl
from jax.experimental.pallas import tpu as pltpu

_LANES = 128                 # samples per slab row (one f32 vreg lane span)
_SUBLANES = 8                # f32 sublane granularity
_PAIR = 2 * _LANES           # 256 interleaved values (128 samples x 2 feats)


def _linear_kernel(x_ref, w_ref, b_ref, o_ref):
    # x_ref: (blk, 256) f32 VMEM tile, lanes = [x0_0, x1_0, x0_1, x1_1, ...].
    # w_ref: (256, 128) f32 VMEM tile, constant across the grid (resident).
    # b_ref: (1,)  f32 in SMEM.
    # o_ref: (blk, 128) f32 VMEM tile; lane s of slab row r = y[128*r + s].
    #
    # One MXU matmul does deinterleave + weighting in a single pass; the bias
    # add is a free VPU broadcast.  Everything is hidden under the HBM DMA.
    o_ref[...] = jnp.dot(
        x_ref[...], w_ref[...],
        preferred_element_type=jnp.float32,
        precision=jax.lax.Precision.HIGHEST,
    ) + b_ref[0]


def _build_deinterleave_weights(w):
    """(256, 128) routing matrix: col s has w0 at row 2s and w1 at row 2s+1."""
    w_flat = w.reshape(-1).astype(jnp.float32)          # (2,)
    rows = jnp.arange(_PAIR, dtype=jnp.int32)[:, None]   # (256, 1)
    cols = jnp.arange(_LANES, dtype=jnp.int32)[None, :]  # (1, 128)
    w_big = jnp.where(rows == 2 * cols, w_flat[0],
                      jnp.where(rows == 2 * cols + 1, w_flat[1], 0.0))
    return w_big.astype(jnp.float32)                      # 128 KiB constant


def _pallas_forward(x, w, b, *, blk_rows=2048):
    """Zero-copy, row-tiled Pallas path. Requires N % 128 == 0."""
    n, in_features = x.shape
    assert in_features == 2, "LinearRegression expects 2 input features"
    assert n % _LANES == 0, "Pallas path requires N % 128 == 0"
    if x.dtype != jnp.float32:
        x = x.astype(jnp.float32)

    m = n // _LANES                      # slab rows
    if m < _SUBLANES:
        # Too small for a sublane-aligned block; XLA is already at roofline.
        return x @ w.T.astype(jnp.float32) + b.astype(jnp.float32)

    # Tile choice (perf review):
    #  * ~2 MiB input tiles (blk_rows=2048) sit near the HBM roofline on all
    #    of v5e / v6e / v7x; per-grid-step fixed cost (~0.35 us) is amortized.
    #  * Cap block rows at ~m/8 so the grid never collapses to 1-2 steps:
    #    keeps the double-buffer pipeline running and gives v7x's two
    #    TensorCores >= 2 blocks each on the "parallel" row axis.
    #  * Double-buffered VMEM at blk=2048: 2*(2 MiB in + 1 MiB out) + 0.25 MiB
    #    resident weights ~= 6.3 MiB -> fits v5e's 16 MiB and v6e/v7x's
    #    32 MiB scoped VMEM defaults with headroom.
    min_steps = 8
    blk = (m // min_steps) // _SUBLANES * _SUBLANES
    blk = min(blk_rows, max(_SUBLANES, blk))
    grid = (pl.cdiv(m, blk),)            # ragged last block is masked by Pallas

    x_slab = x.reshape(m, _PAIR)         # FREE contiguous reshape (no copy)
    w_big = _build_deinterleave_weights(w)
    b_flat = b.reshape(-1).astype(jnp.float32)

    out = pl.pallas_call(
        _linear_kernel,
        out_shape=jax.ShapeDtypeStruct((m, _LANES), jnp.float32),
        grid=grid,
        in_specs=[
            pl.BlockSpec((blk, _PAIR), lambda i: (i, 0)),
            # Same block index every step -> loaded once, stays resident.
            pl.BlockSpec((_PAIR, _LANES), lambda i: (0, 0)),
            pl.BlockSpec(memory_space=pltpu.MemorySpace.SMEM),
        ],
        out_specs=pl.BlockSpec((blk, _LANES), lambda i: (i, 0)),
        compiler_params=pltpu.CompilerParams(
            dimension_semantics=("parallel",)),
    )(x_slab, w_big, b_flat)

    return out.reshape(n, 1)             # FREE contiguous reshape (no copy)


def linear_regression_forward(x, w, b, *, min_pallas_rows=8192):
    """Forward pass of LinearRegression: y = x @ w.T + b.

    Large, lane-aligned batches (N % 128 == 0) take the zero-copy Pallas path.
    Everything else goes to the plain XLA fused matmul+bias, which is a single
    12 B/row pass; wrapping the kernel in pads/slices/concats for unaligned N
    would only add HBM passes (see perf review).
    """
    n = x.shape[0]
    if n >= min_pallas_rows and n % _LANES == 0:
        return _pallas_forward(x, w, b)
    return x.astype(jnp.float32) @ w.T + b


if __name__ == "__main__":
    # Deterministic parameters, exactly as in the PyTorch module's __init__.
    w = jnp.array([[0.1, 0.2]], dtype=jnp.float32)   # (out=1, in=2)
    b = jnp.array([0.0], dtype=jnp.float32)          # (1,)

    key = jax.random.PRNGKey(0)
    k1, k2, k3 = jax.random.split(key, 3)

    # 1) Tiny batch consistent with the module (batch=8, features=2): the
    #    dispatcher routes this to plain XLA (launch overhead >> 24 FLOPs).
    x_small = jax.random.normal(k1, (8, 2), dtype=jnp.float32)
    y_small = jax.block_until_ready(linear_regression_forward(x_small, w, b))
    assert y_small.shape == (8, 1)
    assert jnp.allclose(y_small, x_small @ w.T + b, atol=1e-6)

    # 2) Pallas kernel, lane-aligned N=3072 (24 slab rows). blk_rows=8 forces
    #    a 3-step grid so the tiled / double-buffered path actually runs.
    x_a = jax.random.normal(k2, (3072, 2), dtype=jnp.float32)
    y_a = jax.block_until_ready(_pallas_forward(x_a, w, b, blk_rows=8))
    assert y_a.shape == (3072, 1)
    assert jnp.allclose(y_a, x_a @ w.T + b, atol=1e-5)

    # 3) Pallas kernel with a ragged last block: N=2944 -> 23 slab rows,
    #    blk=8 -> grid of 3 with a 1-row overhang (masked OOB reads/writes).
    x_b = jax.random.normal(k3, (2944, 2), dtype=jnp.float32)
    y_b = jax.block_until_ready(_pallas_forward(x_b, w, b, blk_rows=8))
    assert y_b.shape == (2944, 1)
    assert jnp.allclose(y_b, x_b @ w.T + b, atol=1e-5)

    print("KERNEL_OK")
</pallas_src>

<mosaic_0001>
module attributes {stable_mosaic.version = 11 : i64} {
  func.func @_linear_kernel(%arg0: i32, %arg1: memref<8x256xf32, #tpu.memory_space<vmem>>, %arg2: memref<256x128xf32, #tpu.memory_space<vmem>>, %arg3: memref<1xf32, #tpu.memory_space<smem>>, %arg4: memref<8x128xf32, #tpu.memory_space<vmem>>) attributes {dimension_semantics = [#tpu.dimension_semantics<parallel>], iteration_bounds = array<i64: 3>, scalar_prefetch = 0 : i64, scratch_operands = 0 : i64, tpu.core_type = #tpu.core_type<tc>, window_params = [{transform_indices = @transform_0, window_bounds = array<i64: 8, 256>}, {pipeline_mode = #tpu.pipeline_mode<synchronous>, transform_indices = @transform_1, window_bounds = array<i64: 256, 128>}, {transform_indices = @transform_2, window_bounds = array<i64: 1>}, {transform_indices = @transform_3, window_bounds = array<i64: 8, 128>}]} {
    %c0 = arith.constant 0 : index
    %c0_0 = arith.constant 0 : index
    %0 = vector.load %arg1[%c0, %c0_0] : memref<8x256xf32, #tpu.memory_space<vmem>>, vector<8x256xf32>
    %c0_1 = arith.constant 0 : index
    %c0_2 = arith.constant 0 : index
    %1 = vector.load %arg2[%c0_1, %c0_2] : memref<256x128xf32, #tpu.memory_space<vmem>>, vector<256x128xf32>
    %cst = arith.constant dense<0.000000e+00> : vector<8x128xf32>
    %2 = tpu.matmul %0, %1, %cst {dimension_numbers = #tpu.dot_dimension_numbers<[1], [0], [0], [1], [0, 0, 1, 1], [], []>, precision = #tpu.contract_precision<fp32>} : vector<8x256xf32>, vector<256x128xf32>, vector<8x128xf32> -> vector<8x128xf32>
    %c0_3 = arith.constant 0 : index
    %3 = memref.load %arg3[%c0_3] : memref<1xf32, #tpu.memory_space<smem>>
    %4 = vector.broadcast %3 : f32 to vector<8x128xf32>
    %5 = arith.addf %2, %4 : vector<8x128xf32>
    %c0_4 = arith.constant 0 : index
    %c0_5 = arith.constant 0 : index
    %6 = vector.load %arg4[%c0_4, %c0_5] : memref<8x128xf32, #tpu.memory_space<vmem>>, vector<8x128xf32>
    tpu.vector_store %arg4[%c0_4, %c0_5], %5 {strides = array<i32>} : memref<8x128xf32, #tpu.memory_space<vmem>>, vector<8x128xf32>,
    return
  }
  func.func @transform_0(%arg0: i32) -> (i32, i32) {
    %c0_i32 = arith.constant 0 : i32
    %c0_i32_0 = arith.constant 0 : i32
    return %arg0, %c0_i32 : i32, i32
  }
  func.func @transform_1(%arg0: i32) -> (i32, i32) {
    %c0_i32 = arith.constant 0 : i32
    %c0_i32_0 = arith.constant 0 : i32
    %c0_i32_1 = arith.constant 0 : i32
    return %c0_i32, %c0_i32_0 : i32, i32
  }
  func.func @transform_2(%arg0: i32) -> i32 {
    %c0_i32 = arith.constant 0 : i32
    %c0_i32_0 = arith.constant 0 : i32
    return %c0_i32 : i32
  }
  func.func @transform_3(%arg0: i32) -> (i32, i32) {
    %c0_i32 = arith.constant 0 : i32
    %c0_i32_0 = arith.constant 0 : i32
    return %arg0, %c0_i32 : i32, i32
  }
}

</mosaic_0001>

<bundles_post_ra>
// kernel: tpu_custom_call.1
= control target key start
LH: loop header
LB: loop body
LE: loop exit
PB: predicated region body
PF: predicated region fallthrough
CT: control target
= control target key end

     0   :  { %s2421_s0 = inlined_call_operand.hbm [shape: f32[24,256], index: 0, kind: input, shape index: {}]   ;;  %s2422_s1 = inlined_call_operand.hbm [shape: f32[256,128], index: 1, kind: input, shape index: {}]   ;;  %s2423_s2 = inlined_call_operand.<no memory space> [shape: f32[1], index: 2, kind: input, shape index: {}]   ;;  %s2424_s3 = inlined_call_operand.hbm [shape: f32[24,128], index: 3, kind: output, shape index: {}]  }
   0x1   :  { %8 = sst [smem:[#allocation2]] %s2423_s2 }
   0x2   :  { %9 = vsyncpa [#allocation4], 0 }
   0x3   :  { %11 = vsyncpa [#allocation4 + $0x1], 0 }
   0x4   :  { %12 = vsyncpa [#allocation7], 0 }
   0x5   :  { %13 = vsyncpa [#allocation5], 0 }
   0x6   :  { %15 = vsyncpa [#allocation5 + $0x1], 0  ;;  %s1831_s14 = smov 0   ;;  %s1833_s15 = smov 0  }
   0x7   :  { %s1835_s16 = smov 0   ;;  %s1837_s17 = smov 0  }
   0x8 LB: > { %s1852_s2 = sadd.s32 4294967295, %s1801_s17   ;;  %s1196_s18 = sadd.s32 4294967294, %s1801_s17   ;;  %s1801_s17 = sphi %s1837_s17, %s2533_s17   ;;  %s1797_s16 = sphi %s1835_s16, %s2532_s16   ;;  %s1793_s15 = sphi %s1833_s15, %s2531_s15   ;;  %s1789_s14 = sphi %s1831_s14, %s2530_s14  }
   0x9   : > { %p41_p0 = scmp.ne.s32.totalorder %s1793_s15, %s1789_s14  ;;  %p2425_p1 = scmp.eq.s32.totalorder %s1852_s2, 0 }
   0xa   : > { %p113_p3 = scmp.eq.s32.totalorder %s1196_s18, 2  ;;  %p1197_p5 = scmp.ge.s32.totalorder %s1801_s17, 1 }
   0xb   : > { %p1861_p4 = por %p2425_p1, %p41_p0  ;;  %p120_p7 = scmp.lt.s32.totalorder %s1801_s17, 4 }
   0xc   : > { %p1866_p6 = por %p113_p3, %p41_p0  ;;  %s1803_s22 = smov [#allocation6]  }
   0xd   : > { %s2473_s19 = scalar_select %p1861_p4, 1, 0 }
   0xe   : > { %s2474_s20 = scalar_select %p1866_p6, 1, 0 }
   0xf   : > { %p1871_p8 = pnand %p1197_p5, %p120_p7  ;;  %s132_s23 = sshll.u32 %s1803_s22, 4  ;;  %s133_s23 = int_to_ptr.vmem [resolvable:$true] %s132_s23 }
  0x10   : > { %s1884_s25 = sadd.s32 1, %s1801_s17   ;;  %s28_s26 = sadd.s32 1, %s1797_s16 }
  0x11   : > { %s2475_s21 = scalar_select %p1871_p8, 1, 0 }
  0x12   : > { %p1622_p9 = pneg %p1871_p8  ;;  %s25_s27 = ssub.s32 %s1801_s17, %s1884_s25 }
  0x13   : > { %s1673_s30 = scalar_lea.hbm %s2422_s1, 4096 }
  0x14   : > { %p1879_p10 = pnand %p1622_p9, %p2425_p1  ;;  %p1674_p11 = scmp.ne.s32.totalorder %s2422_s1, %s1673_s30 }
  0x15   : > { %p1680_p3 = scmp.lt.u32.totalorder %s1673_s30, %s2422_s1 }
  0x16   : > { %p1675_p12 = pneg %p1879_p10 }
  0x18   : > { %p1676_p13 = pnand %p1675_p12, %p1674_p11 }
  0x1a   : > { %p1677_p0 = pneg %p1676_p13 }
  0x1c   : > { %p1682_p5 = pnand %p1680_p3, %p1677_p0 }
  0x1e   : > { %1685 = shalt.err (!%p1682_p5)
}
  0x1f   : > { %s1686_s8 = scalar_lea.vmem %s133_s23, 4096  ;;  %p1694_p2 = scmp.lt.s32.totalorder %s133_s23, %s133_s23 }
  0x20   : > { %p1687_p7 = scmp.ne.s32.totalorder %s133_s23, %s1686_s8  ;;  %p1695_p6 = scmp.lt.s32.totalorder %s1686_s8, %s1686_s8 }
  0x22   : > { %p1689_p9 = pnand %p1687_p7, %p1675_p12  ;;  %p1696_p4 = por %p1695_p6, %p1694_p2 }
  0x24   : > { %p1690_p1 = pneg %p1689_p9 }
  0x26   : > { %p1697_p8 = pnand %p1696_p4, %p1690_p1 }
  0x28   : > { %1700 = shalt.err (!%p1697_p8)
}
  0x29   : > { %s1804_s9 = smov 128   ;;  %s1805_s10 = smov 8  }
  0x2a   : > { %1625 = dma.hbm_to_vmem [thread:$0]  (!%p1879_p10), %s2422_s1, 4096, %s133_s23, [#allocation7], %s1804_s9, %s1804_s9, %s1805_s10  }
  0x2b   : > { %p26_p11 = scmp.eq.s32.totalorder %s25_s27, 0  ;;  %p35_p2 = scmp.ne.s32.totalorder %s1797_s16, %s1793_s15 }
  0x2c   : > { %p36_p1 = scmp.eq.s32.totalorder %s1801_s17, 0  ;;  %p1635_p4 = scmp.lt.s32.totalorder %s1801_s17, 3 }
  0x2d   : > { %s1910_s13 = scalar_select %p26_p11, %s1797_s16, %s28_s26  }
  0x2e   : > { %p37_p6 = por %p36_p1, %p35_p2  ;;  %p2477_p8 = scmp.eq.s32.totalorder %s1852_s2, 2 }
  0x2f   : > { %s149_s22 = sand.u32 1, %s1797_s16   ;;  %s1211_s28 = sshll.u32 %s1801_s17, 8 }
  0x30   : > { %p1914_p12 = por %p2477_p8, %p35_p2  ;;  %s1200_s29 = sshll.u32 %s149_s22, 4 }
  0x31   : > { %s1923_s4 = scalar_lea.hbm %s2421_s0, %s1211_s28  ;;  %s153_s23 = scalar_lea.vmem [#allocation3], %s1200_s29 }
  0x32   : > { %s161_s26 = sshll.u32 %s153_s23, 4  ;;  %p1925_p10 = pnand %p1635_p4, %p37_p6  ;;  %s1929_s26 = int_to_ptr.vmem [resolvable:$true] %s161_s26 }
  0x33   : > { %s150_s5 = scalar_lea.sflag [#allocation4], %s149_s22  ;;  %s1701_s6 = scalar_lea.hbm %s1923_s4, 256 }
  0x34   : > { %p1702_p13 = scmp.ne.s32.totalorder %s1923_s4, %s1701_s6  ;;  %p1703_p0 = pneg %p1925_p10 }
  0x35   : > { %s1706_s9 = scalar_lea.hbm %s2421_s0, 768  ;;  %p1707_p7 = scmp.lt.u32.totalorder %s1923_s4, %s2421_s0 }
  0x36   : > { %p1704_p3 = pnand %p1703_p0, %p1702_p13  ;;  %p1708_p9 = scmp.lt.u32.totalorder %s1706_s9, %s1701_s6 }
  0x37   : > { %p1710_p2 = scmp.lt.u32.totalorder %s1701_s6, %s1923_s4 }
  0x38   : > { %p1705_p5 = pneg %p1704_p3  ;;  %p1709_p11 = por %p1708_p9, %p1707_p7 }
  0x3a   : > { %p1711_p1 = por %p1710_p2, %p1709_p11 }
  0x3c   : > { %p1712_p4 = pnand %p1711_p1, %p1705_p5 }
  0x3e   : > { %1715 = shalt.err (!%p1712_p4)
}
  0x3f   : > { %s1716_s12 = scalar_lea.vmem %s1929_s26, 256  ;;  %s1806_s22 = smov [#allocation3]  }
  0x40   : > { %p1717_p6 = scmp.ne.s32.totalorder %s1929_s26, %s1716_s12  ;;  %s1721_s28 = sshll.u32 %s1806_s22, 4  ;;  %s1722_s28 = int_to_ptr.vmem [resolvable:$false] %s1721_s28 }
  0x41   : > { %s1723_s29 = scalar_lea.vmem %s1722_s28, 512  ;;  %p1724_p3 = scmp.lt.s32.totalorder %s1929_s26, %s1722_s28 }
  0x42   : > { %p1719_p8 = pnand %p1717_p6, %p1703_p0  ;;  %p1725_p7 = scmp.lt.s32.totalorder %s1723_s29, %s1716_s12 }
  0x44   : > { %p1720_p13 = pneg %p1719_p8  ;;  %p1726_p9 = por %p1725_p7, %p1724_p3 }
  0x46   : > { %p1727_p11 = pnand %p1726_p9, %p1720_p13 }
  0x48   : > { %1730 = shalt.err (!%p1727_p11)
}
  0x49   : > { %1629 = dma.hbm_to_vmem [thread:$0]  (!%p1925_p10), %s1923_s4, 256, %s1929_s26, %s150_s5  }
  0x4a   : > { %p2480_p5 = scmp.ne.s32.totalorder %s2475_s21, 0 }
  0x4c   : > { %170 = sbr.rel (%p2480_p5) target bundleno = 446 (0x1be), region = 32 }
  0x53   : > { %s1959_s24 = sand.u32 1, %s1793_s15   ;;  %p2481_p0 = scmp.ne.s32.totalorder %s2473_s19, 0 }
  0x54   : > { %s1204_s30 = sshll.u32 %s1959_s24, 4  ;;  %s173_s23 = scalar_lea.sflag [#allocation4], %s1959_s24 }
  0x55   : > { %s1963_s6 = scalar_lea.vmem [#allocation3], %s1204_s30 }
  0x56   : > { %1776 = dma.done.wait (%p2481_p0), %s173_s23, 256  }
  0x57   : > { %1778 = vsyncadd (%p2481_p0), %s173_s23, 4294967040  ;;  %p2482_p10 = scmp.eq.s32.totalorder %s1852_s2, 0 }
  0x59   : > { %1780 = dma.done.wait (%p2482_p10), [#allocation7], 4096   ;;  %p2483_p2 = pmov %p2482_p10 }
  0x5a   : > { %v221_v0 = vld [vmem:[#allocation6 + $0x80] sm:$0xff]  ;;  %v222_v1 = vld [vmem:[#allocation6 + $0x88] sm:$0xff]  ;;  %v223_v7 = vld [vmem:[#allocation6 + $0x90] sm:$0xff]  ;;  %s237_s19 = sld [smem:[#allocation2]]  ;;  %s1206_s21 = sshll.u32 %s1959_s24, 3 }
  0x5b   : > { %1782 = vsyncadd (%p2483_p2), [#allocation7], 4294963200  ;;  %v205_v2 = vld [vmem:[#allocation6] sm:$0xff]  ;;  %v288_v3 = vand.u32 4294901760, %v221_v0  ;;  %v291_v4 = vand.u32 4294901760, %v222_v1  ;;  %v206_v5 = vld [vmem:[#allocation6 + $0x8] sm:$0xff] }
  0x5c   : > { %v240_v6 = vand.u32 4294901760, %v205_v2  ;;  %v224_v8 = vld [vmem:[#allocation6 + $0x98] sm:$0xff]  ;;  %v243_v9 = vand.u32 4294901760, %v206_v5  ;;  %v294_v10 = vand.u32 4294901760, %v223_v7  ;;  %v207_v12 = vld [vmem:[#allocation6 + $0x10] sm:$0xff]  ;;  %v225_v18 = vld [vmem:[#allocation6 + $0xa0] sm:$0xff] }
  0x5d   : > { %v297_v11 = vand.u32 4294901760, %v224_v8  ;;  %v208_v13 = vld [vmem:[#allocation6 + $0x18] sm:$0xff]  ;;  %v1973_v14 = vpack.c.bf16 %v291_v4, %v288_v3  ;;  %v246_v16 = vand.u32 4294901760, %v207_v12  ;;  %v226_v19 = vld [vmem:[#allocation6 + $0xa8] sm:$0xff]  ;;  %v209_v23 = vld [vmem:[#allocation6 + $0x20] sm:$0xff]  ;;  %v300_v29 = vand.u32 4294901760, %v225_v18 }
  0x5e   : > { %v1975_v15 = vsub.f32 %v205_v2, %v240_v6  ;;  %v249_v17 = vand.u32 4294901760, %v208_v13  ;;  %v1977_v20 = vpack.c.bf16 %v243_v9, %v240_v6  ;;  %v1979_v21 = vsub.f32 %v206_v5, %v243_v9  ;;  %v210_v24 = vld [vmem:[#allocation6 + $0x28] sm:$0xff]  ;;  %v227_v37 = vld [vmem:[#allocation6 + $0xb0] sm:$0xff]  ;;  %v228_v42 = vld [vmem:[#allocation6 + $0xb8] sm:$0xff]  ;;  %s1208_s4 = sshll.u32 %s1852_s2, 7  ;;  %s202_s26 = scalar_lea.vmem [#allocation8], %s1206_s21 }
  0x5f   : > { %v1981_v22 = vpack.c.bf16 %v297_v11, %v294_v10  ;;  %1423 = vmatprep.subr.bf16.mxu0 %v1973_v14  ;;  %v1984_v25 = vsub.f32 %v223_v7, %v294_v10  ;;  %v1986_v26 = vsub.f32 %v224_v8, %v297_v11  ;;  %v1990_v28 = vsub.f32 %v207_v12, %v246_v16  ;;  %v211_v55 = vld [vmem:[#allocation6 + $0x30] sm:$0xff]  ;;  %v212_v56 = vld [vmem:[#allocation6 + $0x38] sm:$0xff]  ;;  %v229_v5 = vld [vmem:[#allocation6 + $0xc0] sm:$0xff]  ;;  %s1116_s27 = sshll.u32 %s202_s26, 4  ;;  %s2378_s8 = scalar_lea.hbm %s2424_s3, %s1208_s4  ;;  %s2380_s27 = int_to_ptr.vmem [resolvable:$true] %s1116_s27 }
  0x60   : > { %v1988_v27 = vpack.c.bf16 %v249_v17, %v246_v16  ;;  %1425 = vmatpush3.bf16.msra.mxu0 %v1977_v20  ;;  %v303_v30 = vand.u32 4294901760, %v226_v19  ;;  %v1993_v31 = vsub.f32 %v221_v0, %v288_v3  ;;  %v1995_v32 = vsub.f32 %v222_v1, %v291_v4  ;;  %v230_v6 = vld [vmem:[#allocation6 + $0xc8] sm:$0xff]  ;;  %v213_v11 = vld [vmem:[#allocation6 + $0x40] sm:$0xff]  ;;  %s1103_s9 = scalar_lea.sflag [#allocation5], %s1959_s24  ;;  %s1731_s10 = scalar_lea.vmem %s2380_s27, 128 }
  0x61   : > { %1427 = vmatprep.subr.bf16.mxu0 %v1981_v22  ;;  %v252_v33 = vand.u32 4294901760, %v209_v23  ;;  %v255_v34 = vand.u32 4294901760, %v210_v24  ;;  %v2444_v35 = vand.u32 4294901760, %v1975_v15  ;;  %v2442_v36 = vand.u32 4294901760, %v1979_v21  ;;  %p1732_p1 = scmp.ne.s32.totalorder %s2380_s27, %s1731_s10  ;;  %s1807_s2 = smov [#allocation8]  }
  0x62   : > { %v2000_v38 = vsub.f32 %v208_v13, %v249_v17  ;;  %v2002_v39 = vpack.c.bf16 %v303_v30, %v300_v29  ;;  %v2004_v40 = vsub.f32 %v225_v18, %v300_v29  ;;  %v2447_v41 = vand.u32 4294901760, %v1993_v31  ;;  %v214_v29 = vld [vmem:[#allocation6 + $0x48] sm:$0xff]  ;;  %s1735_s11 = sshll.u32 %s1807_s2, 4  ;;  %s1736_s11 = int_to_ptr.vmem [resolvable:$false] %s1735_s11 }
  0x63   : > { %v2007_v43 = vsub.f32 %v226_v19, %v303_v30  ;;  %v2446_v44 = vand.u32 4294901760, %v1995_v32  ;;  %v2010_v45 = vpack.c.bf16 %v255_v34, %v252_v33  ;;  %v2012_v46 = vsub.f32 %v209_v23, %v252_v33  ;;  %p1733_p4 = pnand %p1732_p1, %p1914_p12  ;;  %s1737_s12 = scalar_lea.vmem %s1736_s11, 256 }
  0x64   : > { %1429 = vmatpush3.bf16.msra.mxu0 %v1988_v27  ;;  %v467_v47 = vsub.f32 %v1993_v31, %v2447_v41  ;;  %v355_v48 = vsub.f32 %v1975_v15, %v2444_v35  ;;  %v362_v49 = vsub.f32 %v1979_v21, %v2442_v36  ;;  %v306_v50 = vand.u32 4294901760, %v227_v37  ;;  %v204_v41 = vld [vmem:[%s1963_s6 + $0x8] sm:$0xff]  ;;  %p1738_p8 = scmp.lt.s32.totalorder %s2380_s27, %s1736_s11  ;;  %p1739_p13 = scmp.lt.s32.totalorder %s1737_s12, %s1731_s10 }
  0x65   : > { %1431 = vmatprep.subr.bf16.mxu0 %v2002_v39  ;;  %v474_v51 = vsub.f32 %v1995_v32, %v2446_v44  ;;  %v309_v52 = vand.u32 4294901760, %v228_v42  ;;  %v2440_v53 = vand.u32 4294901760, %v1984_v25  ;;  %v2438_v54 = vand.u32 4294901760, %v1986_v26  ;;  %p1734_p6 = pneg %p1733_p4 }
  0x66   : > { %v468_v57 = vand.u32 4294901760, %v467_v47  ;;  %v2030_v58 = vsub.f32 %v210_v24, %v255_v34  ;;  %v356_v59 = vand.u32 4294901760, %v355_v48  ;;  %v363_v60 = vand.u32 4294901760, %v362_v49  ;;  %p1740_p3 = por %p1739_p13, %p1738_p8 }
  0x67   : > { %v475_v61 = vand.u32 4294901760, %v474_v51  ;;  %v2032_v62 = vpack.c.bf16 %v309_v52, %v306_v50  ;;  %v2034_v63 = vsub.f32 %v227_v37, %v306_v50  ;;  %v481_v0 = vsub.f32 %v1984_v25, %v2440_v53 }
  0x68   : > { %1433 = vmatpush3.bf16.msra.mxu0 %v2010_v45  ;;  %v1456_v1 = vpack.c.bf16 %v363_v60, %v356_v59  ;;  %v488_v2 = vsub.f32 %v1986_v26, %v2438_v54  ;;  %v258_v3 = vand.u32 4294901760, %v211_v55  ;;  %v261_v4 = vand.u32 4294901760, %v212_v56  ;;  %v232_v59 = vld [vmem:[#allocation6 + $0xd8] sm:$0xff]  ;;  %p1741_p7 = pnand %p1740_p3, %p1734_p6 }
  0x69   : > { %v1454_v7 = vpack.c.bf16 %v475_v61, %v468_v57  ;;  %1435 = vmatprep.subr.bf16.mxu0 %v2032_v62  ;;  %v482_v8 = vand.u32 4294901760, %v481_v0  ;;  %v2437_v9 = vand.u32 4294901760, %v1990_v28  ;;  %v2435_v10 = vand.u32 4294901760, %v2000_v38  ;;  %v231_v57 = vld [vmem:[#allocation6 + $0xd0] sm:$0xff]  ;;  %v236_v54 = vld [vmem:[#allocation6 + $0xf8] sm:$0xff] }
  0x6a   : > { %v2046_v12 = vsub.f32 %v228_v42, %v309_v52  ;;  %v489_v13 = vand.u32 4294901760, %v488_v2  ;;  %v2048_v16 = vpack.c.bf16 %v261_v4, %v258_v3  ;;  %v2050_v17 = vsub.f32 %v211_v55, %v258_v3 }
  0x6b   : > { %1455 = vmatprep.subr.bf16.mxu1 %v1454_v7  ;;  %v369_v18 = vsub.f32 %v1990_v28, %v2437_v9  ;;  %v376_v19 = vsub.f32 %v2000_v38, %v2435_v10  ;;  %v312_v23 = vand.u32 4294901760, %v229_v5  ;;  %v315_v24 = vand.u32 4294901760, %v230_v6  ;;  %v235_v9 = vld [vmem:[#allocation6 + $0xf0] sm:$0xff] }
  0x6c   : > { %1457 = vmatpush3.bf16.msra.mxu1 %v1456_v1  ;;  %v1458_v30 = vpack.c.bf16 %v489_v13, %v482_v8  ;;  %1437 = vmatpush3.bf16.msra.mxu0 %v2048_v16  ;;  %v2433_v33 = vand.u32 4294901760, %v2004_v40  ;;  %v2432_v34 = vand.u32 4294901760, %v2007_v43  ;;  %v264_v37 = vand.u32 4294901760, %v213_v11  ;;  %v215_v1 = vld [vmem:[#allocation6 + $0x50] sm:$0xff] }
  0x6d   : > { %v2061_v42 = vsub.f32 %v212_v56, %v261_v4  ;;  %v370_v47 = vand.u32 4294901760, %v369_v18  ;;  %v377_v48 = vand.u32 4294901760, %v376_v19  ;;  %v2063_v49 = vpack.c.bf16 %v315_v24, %v312_v23  ;;  %v216_v18 = vld [vmem:[#allocation6 + $0x58] sm:$0xff] }
  0x6e   : > { %1459 = vmatprep.subr.bf16.mxu1 %v1458_v30  ;;  %v2065_v50 = vsub.f32 %v229_v5, %v312_v23  ;;  %v495_v51 = vsub.f32 %v2004_v40, %v2433_v33  ;;  %v502_v52 = vsub.f32 %v2007_v43, %v2432_v34  ;;  %v267_v55 = vand.u32 4294901760, %v214_v29 }
  0x6f   : > { %v1460_v56 = vpack.c.bf16 %v377_v48, %v370_v47  ;;  %1439 = vmatprep.subr.bf16.mxu0 %v2063_v49  ;;  %v2074_v60 = vsub.f32 %v230_v6, %v315_v24  ;;  %v2430_v61 = vand.u32 4294901760, %v2012_v46  ;;  %v2428_v0 = vand.u32 4294901760, %v2030_v58 }
  0x70   : > { %v496_v2 = vand.u32 4294901760, %v495_v51  ;;  %v503_v3 = vand.u32 4294901760, %v502_v52  ;;  %v2078_v4 = vpack.c.bf16 %v267_v55, %v264_v37  ;;  %v2080_v5 = vsub.f32 %v213_v11, %v264_v37 }
  0x71   : > { %1461 = vmatpush3.bf16.msra.mxu1 %v1460_v56  ;;  %v383_v7 = vsub.f32 %v2012_v46, %v2430_v61  ;;  %v390_v6 = vsub.f32 %v2030_v58, %v2428_v0  ;;  %v318_v8 = vand.u32 4294901760, %v231_v57  ;;  %v321_v13 = vand.u32 4294901760, %v232_v59  ;;  %v234_v0 = vld [vmem:[#allocation6 + $0xe8] sm:$0xff] }
  0x72   : > { %v1462_v19 = vpack.c.bf16 %v503_v3, %v496_v2  ;;  %1441 = vmatpush3.bf16.msra.mxu0 %v2078_v4  ;;  %v2429_v23 = vand.u32 4294901760, %v2034_v63  ;;  %v2431_v11 = vand.u32 4294901760, %v2046_v12  ;;  %v270_v24 = vand.u32 4294901760, %v215_v1  ;;  %v233_v3 = vld [vmem:[#allocation6 + $0xe0] sm:$0xff] }
  0x73   : > { %v2091_v30 = vsub.f32 %v214_v29, %v267_v55  ;;  %v384_v37 = vand.u32 4294901760, %v383_v7  ;;  %v391_v47 = vand.u32 4294901760, %v390_v6  ;;  %v2093_v48 = vpack.c.bf16 %v321_v13, %v318_v8  ;;  %v217_v6 = vld [vmem:[#allocation6 + $0x60] sm:$0xff] }
  0x74   : > { %1463 = vmatprep.subr.bf16.mxu1 %v1462_v19  ;;  %v2095_v51 = vsub.f32 %v231_v57, %v318_v8  ;;  %v509_v52 = vsub.f32 %v2034_v63, %v2429_v23  ;;  %v516_v56 = vsub.f32 %v2046_v12, %v2431_v11  ;;  %v273_v2 = vand.u32 4294901760, %v216_v18  ;;  %v218_v11 = vld [vmem:[#allocation6 + $0x68] sm:$0xff] }
  0x75   : > { %v1464_v29 = vpack.c.bf16 %v391_v47, %v384_v37  ;;  %1443 = vmatprep.subr.bf16.mxu0 %v2093_v48  ;;  %v2104_v55 = vsub.f32 %v232_v59, %v321_v13  ;;  %v2434_v7 = vand.u32 4294901760, %v2050_v17  ;;  %v2436_v57 = vand.u32 4294901760, %v2061_v42 }
  0x76   : > { %v510_v8 = vand.u32 4294901760, %v509_v52  ;;  %v517_v19 = vand.u32 4294901760, %v516_v56  ;;  %v2108_v23 = vpack.c.bf16 %v273_v2, %v270_v24  ;;  %v2110_v61 = vsub.f32 %v215_v1, %v270_v24 }
  0x77   : > { %1465 = vmatpush3.bf16.msra.mxu1 %v1464_v29  ;;  %v397_v37 = vsub.f32 %v2050_v17, %v2434_v7  ;;  %v404_v59 = vsub.f32 %v2061_v42, %v2436_v57  ;;  %v324_v13 = vand.u32 4294901760, %v233_v3  ;;  %v327_v47 = vand.u32 4294901760, %v234_v0 }
  0x78   : > { %2484 = vst [vmem:[#allocation12_spill] sm:$0xff] %v2108_v23  ;;  %v1466_v34 = vpack.c.bf16 %v517_v19, %v510_v8  ;;  %1445 = vmatpush3.bf16.msra.mxu0 %v2108_v23  ;;  %v2439_v52 = vand.u32 4294901760, %v2065_v50  ;;  %v2441_v1 = vand.u32 4294901760, %v2074_v60  ;;  %v276_v24 = vand.u32 4294901760, %v217_v6 }
  0x79   : > { %v2121_v56 = vsub.f32 %v216_v18, %v273_v2  ;;  %v398_v29 = vand.u32 4294901760, %v397_v37  ;;  %v405_v33 = vand.u32 4294901760, %v404_v59  ;;  %v2123_v7 = vpack.c.bf16 %v327_v47, %v324_v13  ;;  %v219_v37 = vld [vmem:[#allocation6 + $0x70] sm:$0xff] }
  0x7a   : > { %1467 = vmatprep.subr.bf16.mxu1 %v1466_v34  ;;  %v2125_v10 = vsub.f32 %v233_v3, %v324_v13  ;;  %v523_v8 = vsub.f32 %v2065_v50, %v2439_v52  ;;  %v530_v19 = vsub.f32 %v2074_v60, %v2441_v1  ;;  %v279_v57 = vand.u32 4294901760, %v218_v11  ;;  %v220_v1 = vld [vmem:[#allocation6 + $0x78] sm:$0xff] }
  0x7b   : > { %2485 = vst [vmem:[#allocation13_spill] sm:$0xff] %v2123_v7  ;;  %v1468_v18 = vpack.c.bf16 %v405_v33, %v398_v29  ;;  %1447 = vmatprep.subr.bf16.mxu0 %v2123_v7  ;;  %v2134_v2 = vsub.f32 %v234_v0, %v327_v47  ;;  %v2443_v34 = vand.u32 4294901760, %v2080_v5  ;;  %v2445_v3 = vand.u32 4294901760, %v2091_v30 }
  0x7c   : > { %v524_v59 = vand.u32 4294901760, %v523_v8  ;;  %v531_v13 = vand.u32 4294901760, %v530_v19  ;;  %v2138_v52 = vpack.c.bf16 %v279_v57, %v276_v24  ;;  %v2140_v53 = vsub.f32 %v217_v6, %v276_v24 }
  0x7d   : > { %1469 = vmatpush3.bf16.msra.mxu1 %v1468_v18  ;;  %v411_v33 = vsub.f32 %v2080_v5, %v2443_v34  ;;  %v418_v0 = vsub.f32 %v2091_v30, %v2445_v3  ;;  %v330_v47 = vand.u32 4294901760, %v235_v9  ;;  %v333_v29 = vand.u32 4294901760, %v236_v54 }
  0x7e   : > { %2486 = vst [vmem:[#allocation14_spill] sm:$0xff] %v2138_v52  ;;  %v1470_v36 = vpack.c.bf16 %v531_v13, %v524_v59  ;;  %1449 = vmatpush3.bf16.msra.mxu0 %v2138_v52  ;;  %v2450_v8 = vand.u32 4294901760, %v2095_v51  ;;  %v2451_v6 = vand.u32 4294901760, %v2104_v55  ;;  %v282_v24 = vand.u32 4294901760, %v219_v37 }
  0x7f   : > { %v2151_v19 = vsub.f32 %v218_v11, %v279_v57  ;;  %v412_v18 = vand.u32 4294901760, %v411_v33  ;;  %v419_v34 = vand.u32 4294901760, %v418_v0  ;;  %v2153_v35 = vpack.c.bf16 %v333_v29, %v330_v47 }
  0x80   : > { %1471 = vmatprep.subr.bf16.mxu1 %v1470_v36  ;;  %v2155_v3 = vsub.f32 %v235_v9, %v330_v47  ;;  %v537_v59 = vsub.f32 %v2095_v51, %v2450_v8  ;;  %v544_v13 = vsub.f32 %v2104_v55, %v2451_v6  ;;  %v285_v44 = vand.u32 4294901760, %v220_v1  ;;  %v203_v9 = vld [vmem:[%s1963_s6] sm:$0xff] }
  0x81   : > { %2487 = vst [vmem:[#allocation15_spill] sm:$0xff] %v2153_v35  ;;  %v1472_v52 = vpack.c.bf16 %v419_v34, %v412_v18  ;;  %1451 = vmatprep.subr.bf16.mxu0 %v2153_v35  ;;  %v2165_v11 = vsub.f32 %v236_v54, %v333_v29  ;;  %v2452_v57 = vand.u32 4294901760, %v2110_v61  ;;  %v2453_v36 = vand.u32 4294901760, %v2121_v56 }
  0x82   : > { %v538_v33 = vand.u32 4294901760, %v537_v59  ;;  %v545_v0 = vand.u32 4294901760, %v544_v13  ;;  %v2170_v47 = vpack.c.bf16 %v285_v44, %v282_v24  ;;  %v2172_v8 = vsub.f32 %v219_v37, %v282_v24 }
  0x83   : > { %1473 = vmatpush3.bf16.msra.mxu1 %v1472_v52  ;;  %v425_v34 = vsub.f32 %v2110_v61, %v2452_v57  ;;  %v432_v54 = vsub.f32 %v2121_v56, %v2453_v36  ;;  %v2180_v29 = vand.u32 4294901760, %v204_v41  ;;  %v2456_v18 = vand.u32 4294901760, %v2125_v10 }
  0x84   : > { %2488 = vst [vmem:[#allocation16_spill] sm:$0xff] %v2170_v47  ;;  %v1474_v6 = vpack.c.bf16 %v545_v0, %v538_v33  ;;  %1453 = vmatpush3.bf16.msra.mxu0 %v2170_v47  ;;  %v2462_v59 = vand.u32 4294901760, %v2134_v2  ;;  %v1486_v52 = vpack.c.bf16 %v1995_v32, %v1993_v31  ;;  %v2187_v37 = vand.u32 4294901760, %v203_v9 }
  0x85   : > { %2489 = vst [vmem:[#allocation17_spill] sm:$0xff] %v2180_v29  ;;  %v426_v24 = vand.u32 4294901760, %v425_v34  ;;  %v433_v13 = vand.u32 4294901760, %v432_v54  ;;  %v2190_v57 = vsub.f32 %v204_v41, %v2180_v29  ;;  %v551_v36 = vsub.f32 %v2125_v10, %v2456_v18  ;;  %576 = vmatprep.mubr.f32.mxu1 %v2180_v29 }
  0x86   : > { %1475 = vmatprep.subr.bf16.mxu1 %v1474_v6  ;;  %v558_v33 = vsub.f32 %v2134_v2, %v2462_v59  ;;  %1487 = vmatprep.subr.bf16.mxu0 %v1486_v52  ;;  %v2200_v0 = vsub.f32 %v203_v9, %v2187_v37  ;;  %v2461_v34 = vand.u32 4294901760, %v2140_v53  ;;  %v2463_v41 = vand.u32 4294901760, %v2151_v19 }
  0x87   : > { %v2204_v54 = vsub.f32 %v220_v1, %v285_v44  ;;  %v1476_v47 = vpack.c.bf16 %v433_v13, %v426_v24  ;;  %v2464_v18 = vand.u32 4294901760, %v2190_v57  ;;  %v552_v35 = vand.u32 4294901760, %v551_v36 }
  0x88   : > { %v559_v29 = vand.u32 4294901760, %v558_v33  ;;  %v343_v6 = vand.u32 4294901760, %v2200_v0  ;;  %v439_v52 = vsub.f32 %v2140_v53, %v2461_v34  ;;  %v446_v9 = vsub.f32 %v2151_v19, %v2463_v41 }
  0x89   : > { %1477 = vmatpush3.bf16.msra.mxu1 %v1476_v47  ;;  %v338_v44 = vsub.f32 %v2190_v57, %v2464_v18  ;;  %v1488_v1 = vpack.c.bf16 %v1979_v21, %v1975_v15  ;;  %v2469_v36 = vand.u32 4294901760, %v2155_v3  ;;  %v2472_v24 = vand.u32 4294901760, %v2165_v11 }
  0x8a   : > { %v1478_v13 = vpack.c.bf16 %v559_v29, %v552_v35  ;;  %v344_v33 = vsub.f32 %v2200_v0, %v343_v6  ;;  %v440_v34 = vand.u32 4294901760, %v439_v52  ;;  %v447_v59 = vand.u32 4294901760, %v446_v9 }
  0x8b   : > { %v339_v41 = vand.u32 4294901760, %v338_v44  ;;  %v565_v47 = vsub.f32 %v2155_v3, %v2469_v36  ;;  %v572_v18 = vsub.f32 %v2165_v11, %v2472_v24  ;;  %v2471_v7 = vand.u32 4294901760, %v2172_v8 }
  0x8c   : > { %1479 = vmatprep.subr.bf16.mxu1 %v1478_v13  ;;  %v345_v23 = vand.u32 4294901760, %v344_v33  ;;  %v1480_v35 = vpack.c.bf16 %v447_v59, %v440_v34  ;;  %v1490_v29 = vpack.c.bf16 %v1986_v26, %v1984_v25  ;;  %v2470_v52 = vand.u32 4294901760, %v2204_v54 }
  0x8d   : > { %340 = vmatprep.mubr.f32.mxu0 %v339_v41  ;;  %v566_v9 = vand.u32 4294901760, %v565_v47  ;;  %v573_v44 = vand.u32 4294901760, %v572_v18  ;;  %v453_v36 = vsub.f32 %v2172_v8, %v2471_v7  ;;  %v1492_v33 = vpack.c.bf16 %v2000_v38, %v1990_v28 }
  0x8e   : > { %346 = vmatmul.mubr.f32.vlgmr.msra.gmra.mrb[0].mxu0 %v345_v23  ;;  %1481 = vmatpush3.bf16.msra.mxu1 %v1480_v35  ;;  %v460_v13 = vsub.f32 %v2204_v54, %v2470_v52  ;;  %v1494_v41 = vpack.c.bf16 %v2007_v43, %v2004_v40  ;;  %v1496_v23 = vpack.c.bf16 %v2030_v58, %v2012_v46  ;;  %v2491_v35 = vand.u32 4294901760, %v1995_v32 }
  0x8f   : > { %1489 = vmatpush3.bf16.msra.mxu0 %v1488_v1  ;;  %v1482_v59 = vpack.c.bf16 %v573_v44, %v566_v9  ;;  %v454_v34 = vand.u32 4294901760, %v453_v36  ;;  %713 = vmatprep.mubr.f32.mxu0 %v2190_v57  ;;  %v1498_v47 = vpack.c.bf16 %v2046_v12, %v2034_v63  ;;  %v2490_v36 = vand.u32 4294901760, %v1993_v31 }
  0x90   : > { %1491 = vmatprep.subr.bf16.mxu0 %v1490_v29  ;;  %v461_v18 = vand.u32 4294901760, %v460_v13  ;;  %v2492_v44 = vand.u32 4294901760, %v1975_v15  ;;  %v2493_v29 = vand.u32 4294901760, %v1979_v21  ;;  %v2494_v52 = vand.u32 4294901760, %v1984_v25 }
  0x91   : > { %1483 = vmatprep.subr.bf16.mxu1 %v1482_v59  ;;  %v1550_v9 = vpack.c.bf16 %v2491_v35, %v2490_v36  ;;  %v2495_v59 = vand.u32 4294901760, %v1986_v26  ;;  %v2496_v24 = vand.u32 4294901760, %v1990_v28  ;;  %v2498_v31 = vand.u32 4294901760, %v2004_v40 }
  0x92   : > { %v1484_v1 = vpack.c.bf16 %v461_v18, %v454_v34  ;;  %v1552_v13 = vpack.c.bf16 %v2493_v29, %v2492_v44  ;;  %v2497_v34 = vand.u32 4294901760, %v2000_v38  ;;  %v2499_v32 = vand.u32 4294901760, %v2007_v43  ;;  %v2514_v29 = vld [vmem:[#allocation14_spill] sm:$0xff] }
  0x93   : > { %v1554_v7 = vpack.c.bf16 %v2495_v59, %v2494_v52  ;;  %1493 = vmatpush3.bf16.msra.mxu0 %v1492_v33  ;;  %v2500_v15 = vand.u32 4294901760, %v2012_v46  ;;  %v2501_v21 = vand.u32 4294901760, %v2030_v58  ;;  %v2502_v25 = vand.u32 4294901760, %v2034_v63  ;;  %v2515_v59 = vld [vmem:[#allocation15_spill] sm:$0xff] }
  0x94   : > { %v1556_v18 = vpack.c.bf16 %v2497_v34, %v2496_v24  ;;  %v1558_v36 = vpack.c.bf16 %v2499_v32, %v2498_v31  ;;  %v2503_v26 = vand.u32 4294901760, %v2046_v12  ;;  %1485 = vmatpush3.bf16.msra.mxu1 %v1484_v1  ;;  %1495 = vmatprep.subr.bf16.mxu0 %v1494_v41  ;;  %v2504_v28 = vand.u32 4294901760, %v2050_v17  ;;  %v2516_v34 = vld [vmem:[#allocation16_spill] sm:$0xff] }
  0x95   : > { %v1560_v35 = vpack.c.bf16 %v2501_v21, %v2500_v15  ;;  %v2505_v38 = vand.u32 4294901760, %v2061_v42  ;;  %v2506_v43 = vand.u32 4294901760, %v2065_v50  ;;  %v2507_v24 = vand.u32 4294901760, %v2074_v60  ;;  %1519 = vmatprep.subr.bf16.mxu1 %v1973_v14 }
  0x96   : > { %v1562_v52 = vpack.c.bf16 %v2503_v26, %v2502_v25  ;;  %v2508_v58 = vand.u32 4294901760, %v2080_v5  ;;  %v2509_v33 = vand.u32 4294901760, %v2091_v30  ;;  %v1500_v12 = vpack.c.bf16 %v2061_v42, %v2050_v17 }
  0x97   : > { %v1564_v40 = vpack.c.bf16 %v2505_v38, %v2504_v28  ;;  %v1566_v46 = vpack.c.bf16 %v2507_v24, %v2506_v43  ;;  %578 = vmatmul.mubr.f32.vlgmr.msra.gmra.mrb[0].mxu1 %v2187_v37  ;;  %1497 = vmatpush3.bf16.msra.mxu0 %v1496_v23  ;;  %v1502_v41 = vpack.c.bf16 %v2074_v60, %v2065_v50  ;;  %v2510_v1 = vand.u32 4294901760, %v2190_v57  ;;  %v2511_v57 = vld [vmem:[#allocation12_spill] sm:$0xff]  ;;  %v2512_v23 = vld [vmem:[#allocation13_spill] sm:$0xff] }
  0x98   : > { %v1568_v63 = vpack.c.bf16 %v2509_v33, %v2508_v58  ;;  %1521 = vmatpush3.bf16.msra.mxu1 %v1977_v20  ;;  %1499 = vmatprep.subr.bf16.mxu0 %v1498_v47  ;;  %v1504_v44 = vpack.c.bf16 %v2091_v30, %v2080_v5  ;;  %v1506_v17 = vpack.c.bf16 %v2104_v55, %v2095_v51  ;;  %v2513_v47 = vld [vmem:[#allocation17_spill] sm:$0xff] }
  0x99   : > { %1523 = vmatprep.subr.bf16.mxu1 %v1981_v22  ;;  %820 = vmatprep.mubr.f32.mxu1 %v2510_v1  ;;  %v1508_v42 = vpack.c.bf16 %v2121_v56, %v2110_v61  ;;  %v1510_v50 = vpack.c.bf16 %v2134_v2, %v2125_v10  ;;  %v1512_v60 = vpack.c.bf16 %v2151_v19, %v2140_v53 }
  0x9a   : > { %v1514_v5 = vpack.c.bf16 %v2165_v11, %v2155_v3  ;;  %v1516_v30 = vpack.c.bf16 %v2204_v54, %v2172_v8 }
  0x9b   : > { %1501 = vmatpush3.bf16.msra.mxu0 %v1500_v12 }
  0x9c   : > { %1525 = vmatpush3.bf16.msra.mxu1 %v1988_v27  ;;  %1503 = vmatprep.subr.bf16.mxu0 %v1502_v41 }
  0x9d   : > { %1527 = vmatprep.subr.bf16.mxu1 %v2002_v39 }
  0x9f   : > { %1505 = vmatpush3.bf16.msra.mxu0 %v1504_v44 }
  0xa0   : > { %1529 = vmatpush3.bf16.msra.mxu1 %v2010_v45  ;;  %1507 = vmatprep.subr.bf16.mxu0 %v1506_v17 }
  0xa1   : > { %1531 = vmatprep.subr.bf16.mxu1 %v2032_v62 }
  0xa3   : > { %1509 = vmatpush3.bf16.msra.mxu0 %v1508_v42 }
  0xa4   : > { %1533 = vmatpush3.bf16.msra.mxu1 %v2048_v16  ;;  %1511 = vmatprep.subr.bf16.mxu0 %v1510_v50 }
  0xa5   : > { %1535 = vmatprep.subr.bf16.mxu1 %v2063_v49 }
  0xa7   : > { %1513 = vmatpush3.bf16.msra.mxu0 %v1512_v60 }
  0xa8   : > { %1537 = vmatpush3.bf16.msra.mxu1 %v2078_v4  ;;  %1515 = vmatprep.subr.bf16.mxu0 %v1514_v5 }
  0xa9   : > { %1539 = vmatprep.subr.bf16.mxu1 %v2093_v48 }
  0xab   : > { %1517 = vmatpush3.bf16.msra.mxu0 %v1516_v30 }
  0xac   : > { %1541 = vmatpush3.bf16.msra.mxu1 %v2511_v57  ;;  %1551 = vmatprep.subr.bf16.mxu0 %v1550_v9  ;;  %v2518_v9 = vand.u32 4294901760, %v2104_v55 }
  0xad   : > { %1543 = vmatprep.subr.bf16.mxu1 %v2512_v23 }
  0xae   : > { %716 = vmatmul.mubr.f32.vlgmr.msra.gmra.mrb[2].mxu0 %v2200_v0  ;;  %v2519_v0 = vand.u32 4294901760, %v2110_v61  ;;  %v2525_v61 = vand.u32 4294901760, %v2155_v3 }
  0xaf   : > { %1553 = vmatpush3.bf16.msra.mxu0 %v1552_v13  ;;  %990 = vmatprep.mubr.f32.mxu0 %v2513_v47 }
  0xb0   : > { %1545 = vmatpush3.bf16.msra.mxu1 %v2514_v29  ;;  %1555 = vmatprep.subr.bf16.mxu0 %v1554_v7  ;;  %v2517_v7 = vand.u32 4294901760, %v2095_v51  ;;  %v2523_v51 = vand.u32 4294901760, %v2140_v53 }
  0xb1   : > { %1547 = vmatprep.subr.bf16.mxu1 %v2515_v59 }
  0xb3   : > { %1557 = vmatpush3.bf16.msra.mxu0 %v1556_v18 }
  0xb4   : > { %1549 = vmatpush3.bf16.msra.mxu1 %v2516_v34  ;;  %1559 = vmatprep.subr.bf16.mxu0 %v1558_v36 }
  0xb5   : > { %1583 = vmatprep.subr.bf16.mxu1 %v1973_v14  ;;  %v1570_v14 = vpack.c.bf16 %v2518_v9, %v2517_v7 }
  0xb7   : > { %824 = vmatmul.mubr.f32.vlgmr.msra.gmra.mrb[2].mxu1 %v343_v6  ;;  %1561 = vmatpush3.bf16.msra.mxu0 %v1560_v35 }
  0xb8   : > { %1585 = vmatpush3.bf16.msra.mxu1 %v1977_v20  ;;  %1563 = vmatprep.subr.bf16.mxu0 %v1562_v52  ;;  %v2520_v20 = vand.u32 4294901760, %v2121_v56 }
  0xb9   : > { %1587 = vmatprep.subr.bf16.mxu1 %v1981_v22  ;;  %1094 = vmatprep.mubr.f32.mxu1 %v2513_v47  ;;  %v2521_v22 = vand.u32 4294901760, %v2125_v10  ;;  %v2527_v10 = vand.u32 4294901760, %v2172_v8 }
  0xba   : > { %v1572_v6 = vpack.c.bf16 %v2520_v20, %v2519_v0 }
  0xbb   : > { %1565 = vmatpush3.bf16.msra.mxu0 %v1564_v40 }
  0xbc   : > { %1589 = vmatpush3.bf16.msra.mxu1 %v1988_v27  ;;  %1567 = vmatprep.subr.bf16.mxu0 %v1566_v46  ;;  %v2522_v27 = vand.u32 4294901760, %v2134_v2 }
  0xbd   : > { %1591 = vmatprep.subr.bf16.mxu1 %v2002_v39  ;;  %v2524_v39 = vand.u32 4294901760, %v2151_v19 }
  0xbe   : > { %v1574_v13 = vpack.c.bf16 %v2522_v27, %v2521_v22 }
  0xbf   : > { %1569 = vmatpush3.bf16.msra.mxu0 %v1568_v63  ;;  %v1576_v55 = vpack.c.bf16 %v2524_v39, %v2523_v51 }
  0xc0   : > { %1593 = vmatpush3.bf16.msra.mxu1 %v2010_v45  ;;  %1571 = vmatprep.subr.bf16.mxu0 %v1570_v14  ;;  %v2526_v45 = vand.u32 4294901760, %v2165_v11 }
  0xc1   : > { %1595 = vmatprep.subr.bf16.mxu1 %v2032_v62  ;;  %v2528_v62 = vand.u32 4294901760, %v2204_v54 }
  0xc2   : > { %v1578_v56 = vpack.c.bf16 %v2526_v45, %v2525_v61 }
  0xc3   : > { %1573 = vmatpush3.bf16.msra.mxu0 %v1572_v6  ;;  %v1580_v2 = vpack.c.bf16 %v2528_v62, %v2527_v10 }
  0xc4   : > { %1597 = vmatpush3.bf16.msra.mxu1 %v2048_v16  ;;  %1575 = vmatprep.subr.bf16.mxu0 %v1574_v13 }
  0xc5   : > { %1599 = vmatprep.subr.bf16.mxu1 %v2063_v49 }
  0xc7   : > { %1577 = vmatpush3.bf16.msra.mxu0 %v1576_v55 }
  0xc8   : > { %1601 = vmatpush3.bf16.msra.mxu1 %v2078_v4  ;;  %1579 = vmatprep.subr.bf16.mxu0 %v1578_v56  ;;  %v238_v4 = vstv %s237_s19 }
  0xc9   : > { %1603 = vmatprep.subr.bf16.mxu1 %v2093_v48 }
  0xcb   : > { %1581 = vmatpush3.bf16.msra.mxu0 %v1580_v2 }
  0xcc   : > { %1605 = vmatpush3.bf16.msra.mxu1 %v2511_v57 }
  0xcd   : > { %1607 = vmatprep.subr.bf16.mxu1 %v2512_v23 }
  0xce   : > { %992 = vmatmul.mubr.f32.vlgmr.msra.gmra.mrb[4].mxu0 %v2187_v37 }
  0xd0   : > { %1609 = vmatpush3.bf16.msra.mxu1 %v2514_v29 }
  0xd1   : > { %1611 = vmatprep.subr.bf16.mxu1 %v2515_v59 }
  0xd4   : > { %1613 = vmatpush3.bf16.msra.mxu1 %v2516_v34 }
  0xd7   : > { %1096 = vmatmul.mubr.f32.vlgmr.msra.gmra.mrb[4].mxu1 %v2187_v37 }
 0x161   : > { %v1244_v53 = vpop.f32.mrb[0].mxu0 }
 0x162   : > { %v1245_v16 = vpop.f32.mrb[1].mxu0 }
 0x163   : > { %v1246_v49 = vadd.f32 %v1245_v16, %v1244_v53 }
 0x165   : > { %v348_v48 = vadd.f32 %v1246_v49, %v238_v4 }
 0x16a   : > { %v1279_v3 = vpop.f32.mrb[0].mxu1 }
 0x16b   : > { %v1280_v8 = vpop.f32.mrb[1].mxu1 }
 0x16c   : > { %v1281_v19 = vadd.f32 %v1280_v8, %v1279_v3 }
 0x16e   : > { %v580_v11 = vadd.f32 %v1281_v19, %v348_v48 }
 0x181   : > { %v1314_v54 = vpop.f32.mrb[2].mxu0 }
 0x182   : > { %v1315_v18 = vpop.f32.mrb[3].mxu0 }
 0x183   : > { %v1316_v31 = vadd.f32 %v1315_v18, %v1314_v54 }
 0x185   : > { %v718_v32 = vadd.f32 %v1316_v31, %v580_v11 }
 0x18a   : > { %v1349_v36 = vpop.f32.mrb[2].mxu1 }
 0x18b   : > { %v1350_v15 = vpop.f32.mrb[3].mxu1 }
 0x18c   : > { %v1351_v21 = vadd.f32 %v1350_v15, %v1349_v36 }
 0x18e   : > { %v826_v37 = vadd.f32 %v1351_v21, %v718_v32 }
 0x1a1   : > { %v1384_v35 = vpop.f32.mrb[4].mxu0 }
 0x1a2   : > { %v1385_v25 = vpop.f32.mrb[5].mxu0 }
 0x1a3   : > { %v1386_v26 = vadd.f32 %v1385_v25, %v1384_v35 }
 0x1a5   : > { %v994_v52 = vadd.f32 %v1386_v26, %v826_v37 }
 0x1aa   : > { %v1419_v28 = vpop.f32.mrb[4].mxu1 }
 0x1ab   : > { %v1420_v38 = vpop.f32.mrb[5].mxu1 }
 0x1ac   : > { %v1421_v40 = vadd.f32 %v1420_v38, %v1419_v28 }
 0x1ae   : > { %v1098_v43 = vadd.f32 %v1421_v40, %v994_v52 }
 0x1b0   : > { %1101 = vst [vmem:[%s202_s26] sm:$0xff] %v1098_v43 }
 0x1b1   : > { %1744 = shalt.err (!%p1741_p7)
}
 0x1b2   : > { %s1745_s22 = scalar_lea.hbm %s2378_s8, 128  ;;  %s1749_s24 = scalar_lea.hbm %s2424_s3, 384 }
 0x1b3   : > { %p1746_p9 = scmp.ne.s32.totalorder %s2378_s8, %s1745_s22  ;;  %p1750_p0 = scmp.lt.u32.totalorder %s2378_s8, %s2424_s3 }
 0x1b4   : > { %p1751_p10 = scmp.lt.u32.totalorder %s1749_s24, %s1745_s22  ;;  %p1753_p1 = scmp.lt.u32.totalorder %s1745_s22, %s2378_s8 }
 0x1b5   : > { %p1747_p11 = pnand %p1746_p9, %p1914_p12 }
 0x1b6   : > { %p1752_p2 = por %p1751_p10, %p1750_p0 }
 0x1b7   : > { %p1748_p5 = pneg %p1747_p11 }
 0x1b8   : > { %p1754_p4 = por %p1753_p1, %p1752_p2 }
 0x1ba   : > { %p1755_p6 = pnand %p1754_p4, %p1748_p5 }
 0x1bc   : > { %1758 = shalt.err (!%p1755_p6)
}
 0x1bd   : > { %1620 = dma.vmem_to_hbm [thread:$0]  (%p1914_p12), %s2380_s27, 128, %s2378_s8, %s1103_s9  }
 0x1be PF: > { %p1637_p8 = scmp.ge.s32.totalorder %s1801_s17, 2  ;;  %s1128_s6 = sand.u32 1, %s1789_s14  }
 0x1bf   : > { %p2529_p13 = scmp.ne.s32.totalorder %s2474_s20, 0  ;;  %s1129_s19 = scalar_lea.sflag [#allocation5], %s1128_s6 }
 0x1c1   : > { %p1631_p3 = pnand %p1637_p8, %p2529_p13 }
 0x1c3   : > { %1784 = dma.done.wait (!%p1631_p3), %s1129_s19, 128  }
 0x1c4   : > { %1786 = vsyncadd (!%p1631_p3), %s1129_s19, 4294967168  ;;  %p18_p7 = scmp.ge.s32.totalorder %s1884_s25, 5   ;;  %s2530_s14 = smov %s1793_s15 }
 0x1c5   : > { %s2531_s15 = smov %s1797_s16  ;;  %s2532_s16 = smov %s1910_s13 }
 0x1c6   : > { %s2533_s17 = smov %s1884_s25  ;;  %20 = sbr.rel (!%p18_p7) target bundleno = 8 (0x8), region = 81 }
 0x1cd   :  { %1134 = vsyncpa [#allocation4], 1 }
 0x1ce   :  { %1136 = vsyncpa [#allocation4 + $0x1], 1 }
 0x1cf   :  { %1137 = vsyncpa [#allocation7], 1 }
 0x1d0   :  { %1138 = vsyncpa [#allocation5], 1 }
 0x1d1   :  { %1140 = vsyncpa [#allocation5 + $0x1], 1 }

</bundles_post_ra>
